<compile_context>
chip_gen: v7x
topology: tpu7x:2x2x1
jax: 0.10.0
libtpu: 0.0.40
codegen_flags: <defaults>
</compile_context>

<pallas_src>
import functools

import jax
import jax.numpy as jnp
from jax.experimental import pallas as pl
from jax.experimental.pallas import tpu as pltpu


def _round_up(x, m):
    return ((x + m - 1) // m) * m


def _fused_embed_kernel(idx_ref, table_ref, out_ref, *, col_vpads, precision):
    # idx_ref:   (TB, C)          int32   categorical indices (all columns)
    # table_ref: (V_pad, D_pad)   f32/bf16 block-diagonal stacked tables
    # out_ref:   (TB, D_pad)      f32     concatenated embeddings (padded D)
    idx = idx_ref[...]                                   # (TB, C)
    table = table_ref[...]                               # (V_pad, D_pad)
    tb = idx.shape[0]

    # Per-column LOCAL one-hot over that column's own lane-aligned window, then
    # a single lane-dim concatenate.  Static Python loop -> fully unrolled.
    pieces = []
    for c, vpad_c in enumerate(col_vpads):
        iota_c = jax.lax.broadcasted_iota(jnp.int32, (tb, vpad_c), 1)
        onehot_c = (iota_c == idx[:, c:c + 1]).astype(table.dtype)   # (TB, vpad_c)
        pieces.append(onehot_c)
    multihot = pieces[0] if len(pieces) == 1 else jnp.concatenate(pieces, axis=1)

    # Block-diagonal slab => each column's selected row lands only in its own
    # D-slice: the matmul output IS the torch.cat(..., dim=1) result.
    out_ref[...] = jnp.dot(
        multihot, table,
        preferred_element_type=jnp.float32,
        precision=precision,
    )


def fused_embedding_lookup(cat_tensor, table_slab, col_vpads, d_total, *, precision):
    """One pallas_call: (B, C) int32 indices -> (B, d_total) f32 embeddings."""
    b, c = cat_tensor.shape
    v_pad, d_pad = table_slab.shape

    if cat_tensor.dtype != jnp.int32:
        cat_tensor = cat_tensor.astype(jnp.int32)

    # Batch tile: minimise padding.  Cap at 256 rows (fills the 256-wide MXU on
    # v6e/v7x; two clean 128-row passes on v5e).
    cap = 256
    n_steps = max(1, -(-b // cap))
    tb = _round_up(-(-b // n_steps), 8)
    b_pad = n_steps * tb
    if b_pad != b:
        # Pad with index 0 (always valid); padded rows are sliced off below.
        cat_tensor = jnp.pad(cat_tensor, ((0, b_pad - b), (0, 0)))

    # Explicit VMEM budget (resident slab strategy; v7x has only 64 MiB VMEM).
    itemsize = table_slab.dtype.itemsize
    table_bytes = v_pad * d_pad * itemsize
    resident = (
        2 * table_bytes            # table block (assume pipeline double-buffer)
        + 2 * tb * c * 4           # index tiles
        + 2 * tb * d_pad * 4       # output tiles
        + 2 * tb * v_pad * itemsize  # multihot + compare temporaries
    )
    if resident > 40 * 1024 * 1024:
        # TODO(synk): for large vocabularies switch to an HBM-resident gather
        # (memory_space=pl.ANY + scalar-prefetched indices / per-row DMA) or a
        # V-tiled "arbitrary" grid axis with pl.when(k==0) accumulator init.
        raise ValueError(
            f"embedding slab too large for the resident-VMEM kernel "
            f"({resident} bytes); use the gather formulation instead."
        )
    vmem_limit = int(min(48 * 1024 * 1024,
                         max(2 * resident + (1 << 20), 32 * 1024 * 1024)))

    kernel = functools.partial(
        _fused_embed_kernel, col_vpads=tuple(col_vpads), precision=precision
    )

    out = pl.pallas_call(
        kernel,
        out_shape=jax.ShapeDtypeStruct((b_pad, d_pad), jnp.float32),
        grid=(b_pad // tb,),
        in_specs=[
            # Index tile marches over the batch.
            pl.BlockSpec((tb, c), lambda i: (i, 0)),
            # Constant block index -> table stays resident in VMEM across steps.
            pl.BlockSpec((v_pad, d_pad), lambda i: (0, 0)),
        ],
        out_specs=pl.BlockSpec((tb, d_pad), lambda i: (i, 0)),
        compiler_params=pltpu.CompilerParams(
            dimension_semantics=("parallel",),
            vmem_limit_bytes=vmem_limit,
        ),
        cost_estimate=pl.CostEstimate(
            flops=2 * b_pad * v_pad * d_pad,
            transcendentals=0,
            bytes_accessed=b_pad * c * 4 + table_bytes + b_pad * d_pad * 4,
        ),
    )(cat_tensor, table_slab)

    # Avoid paying for slices we don't need.
    if b_pad != b:
        out = out[:b]
    if d_pad != d_total:
        out = out[:, :d_total]
    return out


class EmbeddingLayerPallas:
    """JAX/Pallas port of EmbeddingLayer.

    For each col in cat_cols: nn.Embedding(len(cat_code_dict[col]),
    min(50, len(cat_code_dict[col]) // 2)); forward gathers cat_tensor[:, idx]
    through each table and concatenates along dim=1.  All columns are fused
    into one block-diagonal, lane-aligned table slab + a single Pallas kernel.

    exact=True  -> f32 slab + precision=HIGHEST dot (bit-exact gather).
    exact=False -> bf16 slab + single full-rate MXU pass (bf16-rounded values,
                   half the resident VMEM / HBM table traffic).
    """

    def __init__(self, cat_code_dict, cat_cols, key, *, exact=True):
        self.cat_cols = list(cat_cols)
        self.tables = {}
        vocab_sizes = []
        embed_dims = []
        for col in self.cat_cols:
            num_embeddings = len(cat_code_dict[col])
            embedding_dim = min(50, num_embeddings // 2)
            key, sub = jax.random.split(key)
            # nn.Embedding default init: N(0, 1)
            self.tables[col] = jax.random.normal(
                sub, (num_embeddings, embedding_dim), dtype=jnp.float32
            )
            vocab_sizes.append(num_embeddings)
            embed_dims.append(embedding_dim)

        self.d_total = int(sum(embed_dims))
        d_pad = _round_up(max(self.d_total, 128), 128)
        # Lane-align each column's vocab window (multiple of 128) so the kernel
        # can build the one-hot with clean per-column lane-slice compares.
        col_vpads = [_round_up(max(v, 1), 128) for v in vocab_sizes]
        v_pad = int(sum(col_vpads))

        slab_dtype = jnp.float32 if exact else jnp.bfloat16
        slab = jnp.zeros((v_pad, d_pad), dtype=slab_dtype)
        v_off = 0
        d_off = 0
        for col, v, d, vp in zip(self.cat_cols, vocab_sizes, embed_dims, col_vpads):
            slab = slab.at[v_off:v_off + v, d_off:d_off + d].set(
                self.tables[col].astype(slab_dtype)
            )
            v_off += vp
            d_off += d
        self.table_slab = slab
        self.col_vpads = tuple(col_vpads)
        self.precision = (
            jax.lax.Precision.HIGHEST if exact else jax.lax.Precision.DEFAULT
        )

    def __call__(self, cat_tensor):
        # cat_tensor: (B, num_cat_cols) int32
        return fused_embedding_lookup(
            cat_tensor, self.table_slab, self.col_vpads, self.d_total,
            precision=self.precision,
        )


if __name__ == "__main__":
    key = jax.random.PRNGKey(0)

    # Small synthetic categorical vocabulary setup.
    cat_code_dict = {
        "bus_id": list(range(12)),    # embedding dim = min(50, 6)  = 6
        "route": list(range(8)),      # embedding dim = min(50, 4)  = 4
        "weekday": list(range(20)),   # embedding dim = min(50, 10) = 10
    }
    cat_cols = ["bus_id", "route", "weekday"]

    key, k_params, k_idx = jax.random.split(key, 3)
    model = EmbeddingLayerPallas(cat_code_dict, cat_cols, k_params)

    batch = 8
    # Deterministic integer categorical inputs, one column per categorical var.
    cols = []
    for col in cat_cols:
        k_idx, sub = jax.random.split(k_idx)
        cols.append(
            jax.random.randint(sub, (batch,), 0, len(cat_code_dict[col]), dtype=jnp.int32)
        )
    cat_tensor = jnp.stack(cols, axis=1)  # (B, num_cat_cols) int32

    out = model(cat_tensor)
    out = jax.block_until_ready(out)

    # Reference check against plain-JAX per-column embedding gather (torch semantics).
    ref = jnp.concatenate(
        [model.tables[col][cat_tensor[:, i]] for i, col in enumerate(cat_cols)],
        axis=1,
    )
    assert out.shape == (batch, 6 + 4 + 10), out.shape
    assert jnp.allclose(out, ref, atol=1e-5), "mismatch vs reference"

    print("KERNEL_OK")
</pallas_src>

<mosaic_0001>
module attributes {stable_mosaic.version = 11 : i64} {
  func.func @_fused_embed_kernel(%arg0: i32, %arg1: memref<8x3xi32, #tpu.memory_space<vmem>>, %arg2: memref<384x128xf32, #tpu.memory_space<vmem>>, %arg3: memref<8x128xf32, #tpu.memory_space<vmem>>) attributes {dimension_semantics = [#tpu.dimension_semantics<parallel>], iteration_bounds = array<i64: 1>, scalar_prefetch = 0 : i64, scratch_operands = 0 : i64, tpu.core_type = #tpu.core_type<tc>, window_params = [{transform_indices = @transform_0, window_bounds = array<i64: 8, 3>}, {pipeline_mode = #tpu.pipeline_mode<synchronous>, transform_indices = @transform_1, window_bounds = array<i64: 384, 128>}, {transform_indices = @transform_2, window_bounds = array<i64: 8, 128>}]} {
    %c0 = arith.constant 0 : index
    %c0_0 = arith.constant 0 : index
    %0 = vector.load %arg1[%c0, %c0_0] : memref<8x3xi32, #tpu.memory_space<vmem>>, vector<8x3xi32>
    %c0_1 = arith.constant 0 : index
    %c0_2 = arith.constant 0 : index
    %1 = vector.load %arg2[%c0_1, %c0_2] : memref<384x128xf32, #tpu.memory_space<vmem>>, vector<384x128xf32>
    %2 = tpu.iota {dimensions = array<i32: 1>} : vector<8x128xi32>
    %3 = vector.extract_strided_slice %0 {offsets = [0, 0], sizes = [8, 1], strides = [1, 1]} : vector<8x3xi32> to vector<8x1xi32>
    %4 = vector.broadcast %3 : vector<8x1xi32> to vector<8x128xi32>
    %5 = arith.cmpi eq, %2, %4 : vector<8x128xi32>
    %6 = arith.extui %5 : vector<8x128xi1> to vector<8x128xi32>
    %7 = arith.sitofp %6 : vector<8x128xi32> to vector<8x128xf32>
    %8 = tpu.iota {dimensions = array<i32: 1>} : vector<8x128xi32>
    %9 = vector.extract_strided_slice %0 {offsets = [0, 1], sizes = [8, 1], strides = [1, 1]} : vector<8x3xi32> to vector<8x1xi32>
    %10 = vector.broadcast %9 : vector<8x1xi32> to vector<8x128xi32>
    %11 = arith.cmpi eq, %8, %10 : vector<8x128xi32>
    %12 = arith.extui %11 : vector<8x128xi1> to vector<8x128xi32>
    %13 = arith.sitofp %12 : vector<8x128xi32> to vector<8x128xf32>
    %14 = tpu.iota {dimensions = array<i32: 1>} : vector<8x128xi32>
    %15 = vector.extract_strided_slice %0 {offsets = [0, 2], sizes = [8, 1], strides = [1, 1]} : vector<8x3xi32> to vector<8x1xi32>
    %16 = vector.broadcast %15 : vector<8x1xi32> to vector<8x128xi32>
    %17 = arith.cmpi eq, %14, %16 : vector<8x128xi32>
    %18 = arith.extui %17 : vector<8x128xi1> to vector<8x128xi32>
    %19 = arith.sitofp %18 : vector<8x128xi32> to vector<8x128xf32>
    %20 = tpu.concatenate %7, %13, %19 in 1 : vector<8x128xf32>, vector<8x128xf32>, vector<8x128xf32> -> vector<8x384xf32>
    %cst = arith.constant dense<0.000000e+00> : vector<8x128xf32>
    %21 = tpu.matmul %20, %1, %cst {dimension_numbers = #tpu.dot_dimension_numbers<[1], [0], [0], [1], [0, 0, 1, 1], [], []>, precision = #tpu.contract_precision<fp32>} : vector<8x384xf32>, vector<384x128xf32>, vector<8x128xf32> -> vector<8x128xf32>
    %c0_3 = arith.constant 0 : index
    %c0_4 = arith.constant 0 : index
    %22 = vector.load %arg3[%c0_3, %c0_4] : memref<8x128xf32, #tpu.memory_space<vmem>>, vector<8x128xf32>
    tpu.vector_store %arg3[%c0_3, %c0_4], %21 {strides = array<i32>} : memref<8x128xf32, #tpu.memory_space<vmem>>, vector<8x128xf32>,
    return
  }
  func.func @transform_0(%arg0: i32) -> (i32, i32) {
    %c0_i32 = arith.constant 0 : i32
    %c0_i32_0 = arith.constant 0 : i32
    return %arg0, %c0_i32 : i32, i32
  }
  func.func @transform_1(%arg0: i32) -> (i32, i32) {
    %c0_i32 = arith.constant 0 : i32
    %c0_i32_0 = arith.constant 0 : i32
    %c0_i32_1 = arith.constant 0 : i32
    return %c0_i32, %c0_i32_0 : i32, i32
  }
  func.func @transform_2(%arg0: i32) -> (i32, i32) {
    %c0_i32 = arith.constant 0 : i32
    %c0_i32_0 = arith.constant 0 : i32
    return %arg0, %c0_i32 : i32, i32
  }
}

</mosaic_0001>

<bundles_post_ra>
// kernel: tpu_custom_call.1
= control target key start
LH: loop header
LB: loop body
LE: loop exit
PB: predicated region body
PF: predicated region fallthrough
CT: control target
= control target key end

     0   :  { %7 = vsyncpa [#allocation3], 0  ;;  %s3455_s0 = inlined_call_operand.vmem [shape: s32[8,3], index: 0, kind: input, shape index: {}]   ;;  %s3456_s1 = inlined_call_operand.hbm [shape: f32[384,128], index: 1, kind: input, shape index: {}]   ;;  %s3457_s2 = inlined_call_operand.hbm [shape: f32[8,128], index: 2, kind: output, shape index: {}]  }
   0x1   :  { %8 = vsyncpa [#allocation4], 0  ;;  %s2558_s9 = smov [#allocation2]   ;;  %s2510_s13 = scalar_lea.hbm %s3456_s1, 6144 }
   0x2   :  { %s16_s10 = sshll.u32 %s2558_s9, 4  ;;  %p2511_p0 = scmp.ne.s32.totalorder %s3456_s1, %s2510_s13  ;;  %s17_s10 = int_to_ptr.vmem [resolvable:$true] %s16_s10 }
   0x3   :  { %p2514_p1 = scmp.lt.u32.totalorder %s2510_s13, %s3456_s1 }
   0x5   :  { %p2516_p2 = pnand %p2514_p1, %p2511_p0 }
   0x7   :  { %2519 = shalt.err (!%p2516_p2)
}
   0x8   :  { %s2520_s18 = scalar_lea.vmem %s17_s10, 6144  ;;  %p2525_p4 = scmp.lt.s32.totalorder %s17_s10, %s17_s10 }
   0x9   :  { %p2521_p3 = scmp.ne.s32.totalorder %s17_s10, %s2520_s18  ;;  %p2526_p5 = scmp.lt.s32.totalorder %s2520_s18, %s2520_s18 }
   0xb   :  { %p2527_p6 = por %p2526_p5, %p2525_p4 }
   0xd   :  { %p2528_p7 = pnand %p2527_p6, %p2521_p3 }
   0xf   :  { %2531 = shalt.err (!%p2528_p7)
}
  0x10   :  { %s2559_s19 = smov 128   ;;  %s2560_s20 = smov 8  }
  0x11   :  { %22 = dma.hbm_to_vmem [thread:$0]  %s3456_s1, 6144, %s17_s10, [#allocation3], %s2559_s19, %s2559_s19, %s2560_s20  }
  0x12   :  { %2554 = dma.done.wait [#allocation3], 6144  }
  0x13   :  { %2555 = vsyncadd [#allocation3], 4294961152  ;;  %v2561_v0 = vmov 2   ;;  %v2562_v1 = vmov 1   ;;  %v3458_v2 = vmov 0.0|0.0   ;;  %v26_v3 = vld [vmem:[%s3455_s0] sm:$0xff] }
  0x14   :  { %2508 = vset.pattern.permute.xlu1 %v2561_v0  ;;  %2506 = vset.pattern.permute.xlu0 %v2562_v1  ;;  %v59_v4 = vld [vmem:[#allocation2 + $0x100] sm:$0xff]  ;;  %v60_v5 = vld [vmem:[#allocation2 + $0x108] sm:$0xff]  ;;  %v61_v10 = vld [vmem:[#allocation2 + $0x110] sm:$0xff]  ;;  %v2564_v30 = vmov 0   ;;  %vm2565_vm0 = vmmov 0   ;;  %s2568_s0 = smov [#allocation5]  }
  0x15   :  { %2340 = vmatprep.subr.bf16.mxu0 %v3458_v2  ;;  %90 = vperm.xlu1 %2508, %v26_v3   ;;  %v958_v6 = vand.u32 4294901760, %v59_v4  ;;  %v961_v7 = vand.u32 4294901760, %v60_v5  ;;  %v43_v8 = vld [vmem:[#allocation2 + $0x80] sm:$0xff]  ;;  %v44_v9 = vld [vmem:[#allocation2 + $0x88] sm:$0xff]  ;;  %v62_v13 = vld [vmem:[#allocation2 + $0x118] sm:$0xff]  ;;  %v964_v14 = vand.u32 4294901760, %v61_v10 }
  0x16   :  { %84 = vperm.xlu0 %2506, %v26_v3   ;;  %v144_v11 = vand.u32 4294901760, %v43_v8  ;;  %v147_v12 = vand.u32 4294901760, %v44_v9  ;;  %v27_v15 = vld [vmem:[#allocation2] sm:$0xff]  ;;  %v28_v16 = vld [vmem:[#allocation2 + $0x8] sm:$0xff]  ;;  %v967_v20 = vand.u32 4294901760, %v62_v13  ;;  %v45_v21 = vld [vmem:[#allocation2 + $0x90] sm:$0xff] }
  0x17   :  { %v2601_v17 = vpack.c.bf16 %v961_v7, %v958_v6  ;;  %v2603_v18 = vsub.f32 %v59_v4, %v958_v6  ;;  %v2605_v19 = vsub.f32 %v60_v5, %v961_v7  ;;  %v46_v22 = vld [vmem:[#allocation2 + $0x98] sm:$0xff]  ;;  %v63_v23 = vld [vmem:[#allocation2 + $0x120] sm:$0xff]  ;;  %v2613_v27 = vsub.f32 %v61_v10, %v964_v14  ;;  %v64_v28 = vld [vmem:[#allocation2 + $0x128] sm:$0xff]  ;;  %s1605_s1 = sshll.u32 %s2568_s0, 4  ;;  %s1606_s1 = int_to_ptr.vmem [resolvable:$true] %s1605_s1 }
  0x18   :  { %v2607_v24 = vpack.c.bf16 %v147_v12, %v144_v11  ;;  %v2609_v25 = vsub.f32 %v43_v8, %v144_v11  ;;  %v2611_v26 = vsub.f32 %v44_v9, %v147_v12  ;;  %v29_v29 = vld [vmem:[#allocation2 + $0x10] sm:$0xff]  ;;  %v2616_v31 = vpack.c.bf16 %v967_v20, %v964_v14  ;;  %v30_v39 = vld [vmem:[#allocation2 + $0x18] sm:$0xff]  ;;  %v47_v40 = vld [vmem:[#allocation2 + $0xa0] sm:$0xff]  ;;  %s2532_s25 = scalar_lea.vmem %s1606_s1, 128  ;;  %p2537_p9 = scmp.lt.s32.totalorder %s1606_s1, %s1606_s1 }
  0x19   :  { %3588 = vst [vmem:[#allocation8_spill] sm:$0xff] %v2601_v17  ;;  %3589 = vst [vmem:[#allocation9_spill] sm:$0xff] %v2603_v18  ;;  %2342 = vmatpush3.bf16.msra.mxu0 %v2601_v17  ;;  %v2618_v32 = vsub.f32 %v62_v13, %v967_v20  ;;  %v96_v33 = vand.u32 4294901760, %v27_v15  ;;  %v99_v34 = vand.u32 4294901760, %v28_v16  ;;  %v150_v35 = vand.u32 4294901760, %v45_v21  ;;  %v48_v45 = vld [vmem:[#allocation2 + $0xa8] sm:$0xff]  ;;  %p2533_p8 = scmp.ne.s32.totalorder %s1606_s1, %s2532_s25  ;;  %p2538_p10 = scmp.lt.s32.totalorder %s2532_s25, %s2532_s25 }
  0x1a   :  { %3590 = vst [vmem:[#allocation10_spill] sm:$0xff] %v2607_v24  ;;  %2507 = vset.pattern.permute.xlu0 %v2564_v30  ;;  %3591 = vst [vmem:[#allocation11_spill] sm:$0xff] %v2616_v31  ;;  %2343 = vmatprep.subr.bf16.mxu0 %v3458_v2  ;;  %v153_v36 = vand.u32 4294901760, %v46_v22  ;;  %v970_v37 = vand.u32 4294901760, %v63_v23  ;;  %v973_v38 = vand.u32 4294901760, %v64_v28  ;;  %v102_v44 = vand.u32 4294901760, %v29_v29 }
  0x1b   :  { %78 = vperm.xlu0 %2507, %v26_v3   ;;  %2149 = vmatprep.subr.bf16.mxu1 %v2607_v24  ;;  %v2622_v41 = vpack.c.bf16 %v99_v34, %v96_v33  ;;  %v2624_v42 = vsub.f32 %v27_v15, %v96_v33  ;;  %v2626_v43 = vsub.f32 %v28_v16, %v99_v34  ;;  %v65_v46 = vld [vmem:[#allocation2 + $0x130] sm:$0xff]  ;;  %v66_v47 = vld [vmem:[#allocation2 + $0x138] sm:$0xff]  ;;  %v31_v52 = vld [vmem:[#allocation2 + $0x20] sm:$0xff]  ;;  %v105_v56 = vand.u32 4294901760, %v30_v39  ;;  %p2539_p11 = por %p2538_p10, %p2537_p9 }
  0x1c   :  { %v2628_v48 = vpack.c.bf16 %v153_v36, %v150_v35  ;;  %v2630_v49 = vsub.f32 %v45_v21, %v150_v35  ;;  %v2632_v50 = vsub.f32 %v46_v22, %v153_v36  ;;  %v2634_v51 = vpack.c.bf16 %v973_v38, %v970_v37  ;;  %v32_v53 = vld [vmem:[#allocation2 + $0x28] sm:$0xff]  ;;  %v49_v62 = vld [vmem:[#allocation2 + $0xb0] sm:$0xff]  ;;  %v50_v5 = vld [vmem:[#allocation2 + $0xb8] sm:$0xff] }
  0x1d   :  { %3592 = vst [vmem:[#allocation12_spill] sm:$0xff] %v2622_v41  ;;  %3593 = vst [vmem:[#allocation13_spill] sm:$0xff] %v2624_v42  ;;  %2345 = vmatpush3.bf16.msra.mxu0 %v2616_v31  ;;  %2151 = vmatpush3.bf16.msra.mxu1 %v2622_v41  ;;  %v2638_v54 = vsub.f32 %v63_v23, %v970_v37  ;;  %v2640_v55 = vsub.f32 %v64_v28, %v973_v38  ;;  %v156_v58 = vand.u32 4294901760, %v47_v40  ;;  %v67_v6 = vld [vmem:[#allocation2 + $0x140] sm:$0xff]  ;;  %v68_v11 = vld [vmem:[#allocation2 + $0x148] sm:$0xff]  ;;  %p2540_p12 = pnand %p2539_p11, %p2533_p8 }
  0x1e   :  { %3594 = vst [vmem:[#allocation14_spill] sm:$0xff] %v2628_v48  ;;  %3595 = vst [vmem:[#allocation15_spill] sm:$0xff] %v2634_v51  ;;  %v2642_v57 = vsub.f32 %v29_v29, %v102_v44  ;;  %2346 = vmatprep.subr.bf16.mxu0 %v3458_v2  ;;  %2153 = vmatprep.subr.bf16.mxu1 %v2628_v48  ;;  %v159_v59 = vand.u32 4294901760, %v48_v45  ;;  %v976_v60 = vand.u32 4294901760, %v65_v46  ;;  %v979_v61 = vand.u32 4294901760, %v66_v47  ;;  %v33_v12 = vld [vmem:[#allocation2 + $0x30] sm:$0xff] }
  0x1f   :  { %v2646_v63 = vpack.c.bf16 %v105_v56, %v102_v44  ;;  %v2648_v1 = vsub.f32 %v30_v39, %v105_v56  ;;  %v108_v3 = vand.u32 4294901760, %v31_v52  ;;  %v111_v4 = vand.u32 4294901760, %v32_v53  ;;  %2509 = vset.pattern.permute.xlu0 %v2561_v0  ;;  %v34_v13 = vld [vmem:[#allocation2 + $0x38] sm:$0xff]  ;;  %v51_v20 = vld [vmem:[#allocation2 + $0xc0] sm:$0xff]  ;;  %v52_v29 = vld [vmem:[#allocation2 + $0xc8] sm:$0xff] }
  0x20   :  { %v2651_v7 = vpack.c.bf16 %v159_v59, %v156_v58  ;;  %v2653_v8 = vsub.f32 %v47_v40, %v156_v58  ;;  %v2655_v9 = vsub.f32 %v48_v45, %v159_v59  ;;  %v2657_v10 = vpack.c.bf16 %v979_v61, %v976_v60  ;;  %v69_v36 = vld [vmem:[#allocation2 + $0x150] sm:$0xff]  ;;  %v70_v44 = vld [vmem:[#allocation2 + $0x158] sm:$0xff]  ;;  %v35_v45 = vld [vmem:[#allocation2 + $0x40] sm:$0xff] }
  0x21   :  { %3596 = vst [vmem:[#allocation16_spill] sm:$0xff] %v2646_v63  ;;  %2348 = vmatpush3.bf16.msra.mxu0 %v2634_v51  ;;  %2155 = vmatpush3.bf16.msra.mxu1 %v2646_v63  ;;  %v2661_v14 = vsub.f32 %v65_v46, %v976_v60  ;;  %v2663_v15 = vsub.f32 %v66_v47, %v979_v61  ;;  %v162_v16 = vand.u32 4294901760, %v49_v62  ;;  %v165_v23 = vand.u32 4294901760, %v50_v5  ;;  %v36_v56 = vld [vmem:[#allocation2 + $0x48] sm:$0xff]  ;;  %v53_v58 = vld [vmem:[#allocation2 + $0xd0] sm:$0xff]  ;;  %v54_v59 = vld [vmem:[#allocation2 + $0xd8] sm:$0xff] }
  0x22   :  { %3597 = vst [vmem:[#allocation17_spill] sm:$0xff] %v2651_v7  ;;  %3598 = vst [vmem:[#allocation18_spill] sm:$0xff] %v2657_v10  ;;  %v2665_v0 = vpack.c.bf16 %v111_v4, %v108_v3  ;;  %2349 = vmatprep.subr.bf16.mxu0 %v3458_v2  ;;  %2157 = vmatprep.subr.bf16.mxu1 %v2651_v7  ;;  %v2669_v21 = vsub.f32 %v31_v52, %v108_v3  ;;  %v982_v28 = vand.u32 4294901760, %v67_v6  ;;  %v39_v51 = vld [vmem:[#allocation2 + $0x60] sm:$0xff]  ;;  %v58_v41 = vld [vmem:[#allocation2 + $0xf8] sm:$0xff] }
  0x23   :  { %v2671_v22 = vsub.f32 %v32_v53, %v111_v4  ;;  %v2673_v30 = vsub.f32 %v49_v62, %v162_v16  ;;  %v985_v33 = vand.u32 4294901760, %v68_v11  ;;  %v114_v34 = vand.u32 4294901760, %v33_v12  ;;  %v71_v4 = vld [vmem:[#allocation2 + $0x160] sm:$0xff]  ;;  %v41_v17 = vld [vmem:[#allocation2 + $0x70] sm:$0xff] }
  0x24   :  { %3599 = vst [vmem:[#allocation19_spill] sm:$0xff] %v2665_v0  ;;  %v117_v35 = vand.u32 4294901760, %v34_v13  ;;  %v2675_v37 = vpack.c.bf16 %v165_v23, %v162_v16  ;;  %v2677_v38 = vsub.f32 %v50_v5, %v165_v23  ;;  %v2679_v39 = vsub.f32 %v67_v6, %v982_v28  ;;  %v72_v23 = vld [vmem:[#allocation2 + $0x168] sm:$0xff] }
  0x25   :  { %v168_v40 = vand.u32 4294901760, %v51_v20  ;;  %2351 = vmatpush3.bf16.msra.mxu0 %v2657_v10  ;;  %2159 = vmatpush3.bf16.msra.mxu1 %v2665_v0  ;;  %v2683_v46 = vpack.c.bf16 %v985_v33, %v982_v28  ;;  %v2685_v47 = vsub.f32 %v68_v11, %v985_v33  ;;  %v171_v53 = vand.u32 4294901760, %v52_v29  ;;  %v73_v10 = vld [vmem:[#allocation2 + $0x170] sm:$0xff] }
  0x26   :  { %3600 = vst [vmem:[#allocation20_spill] sm:$0xff] %v2675_v37  ;;  %v2687_v52 = vpack.c.bf16 %v117_v35, %v114_v34  ;;  %2352 = vmatprep.subr.bf16.mxu0 %v3458_v2  ;;  %2161 = vmatprep.subr.bf16.mxu1 %v2675_v37  ;;  %v2691_v60 = vsub.f32 %v33_v12, %v114_v34  ;;  %v988_v3 = vand.u32 4294901760, %v69_v36  ;;  %v991_v11 = vand.u32 4294901760, %v70_v44  ;;  %v37_v12 = vld [vmem:[#allocation2 + $0x50] sm:$0xff] }
  0x27   :  { %3601 = vst [vmem:[#allocation21_spill] sm:$0xff] %v2683_v46  ;;  %v2693_v61 = vsub.f32 %v34_v13, %v117_v35  ;;  %v2695_v62 = vsub.f32 %v51_v20, %v168_v40  ;;  %v2697_v5 = vpack.c.bf16 %v171_v53, %v168_v40  ;;  %v2699_v6 = vsub.f32 %v52_v29, %v171_v53  ;;  %v38_v35 = vld [vmem:[#allocation2 + $0x58] sm:$0xff]  ;;  %v55_v40 = vld [vmem:[#allocation2 + $0xe0] sm:$0xff] }
  0x28   :  { %3602 = vst [vmem:[#allocation22_spill] sm:$0xff] %v2687_v52  ;;  %v120_v16 = vand.u32 4294901760, %v35_v45  ;;  %v2701_v28 = vsub.f32 %v69_v36, %v988_v3  ;;  %v123_v33 = vand.u32 4294901760, %v36_v56  ;;  %v174_v2 = vand.u32 4294901760, %v53_v58 }
  0x29   :  { %3603 = vst [vmem:[#allocation23_spill] sm:$0xff] %v2697_v5  ;;  %v177_v37 = vand.u32 4294901760, %v54_v59  ;;  %2354 = vmatpush3.bf16.msra.mxu0 %v2683_v46  ;;  %2163 = vmatpush3.bf16.msra.mxu1 %v2687_v52  ;;  %v2705_v13 = vpack.c.bf16 %v991_v11, %v988_v3  ;;  %v2707_v20 = vsub.f32 %v70_v44, %v991_v11  ;;  %v994_v29 = vand.u32 4294901760, %v71_v4  ;;  %v56_v3 = vld [vmem:[#allocation2 + $0xe8] sm:$0xff]  ;;  %v74_v44 = vld [vmem:[#allocation2 + $0x178] sm:$0xff] }
  0x2a   :  { %v2709_v34 = vsub.f32 %v35_v45, %v120_v16  ;;  %v3605_v53 = vmov 0.0|0.0   ;;  %2165 = vmatprep.subr.bf16.mxu1 %v2697_v5  ;;  %v2713_v36 = vpack.c.bf16 %v123_v33, %v120_v16  ;;  %v2715_v0 = vsub.f32 %v36_v56, %v123_v33 }
  0x2b   :  { %3604 = vst [vmem:[#allocation24_spill] sm:$0xff] %v2705_v13  ;;  %2355 = vmatprep.subr.bf16.mxu0 %v3605_v53  ;;  %v2717_v46 = vpack.c.bf16 %v177_v37, %v174_v2  ;;  %v997_v52 = vand.u32 4294901760, %v72_v23  ;;  %v2719_v11 = vsub.f32 %v53_v58, %v174_v2  ;;  %v2721_v45 = vsub.f32 %v54_v59, %v177_v37  ;;  %v40_v59 = vld [vmem:[#allocation2 + $0x68] sm:$0xff] }
  0x2c   :  { %3606 = vst [vmem:[#allocation25_spill] sm:$0xff] %v2713_v36  ;;  %v2723_v7 = vsub.f32 %v71_v4, %v994_v29  ;;  %v126_v63 = vand.u32 4294901760, %v37_v12  ;;  %v129_v56 = vand.u32 4294901760, %v38_v35  ;;  %v180_v33 = vand.u32 4294901760, %v55_v40 }
  0x2d   :  { %3607 = vst [vmem:[#allocation26_spill] sm:$0xff] %v2717_v46  ;;  %v2725_v48 = vpack.c.bf16 %v997_v52, %v994_v29  ;;  %v2727_v16 = vsub.f32 %v72_v23, %v997_v52  ;;  %2357 = vmatpush3.bf16.msra.mxu0 %v2705_v13  ;;  %2167 = vmatpush3.bf16.msra.mxu1 %v2713_v36  ;;  %v183_v2 = vand.u32 4294901760, %v56_v3  ;;  %v1000_v58 = vand.u32 4294901760, %v73_v10  ;;  %v57_v13 = vld [vmem:[#allocation2 + $0xf0] sm:$0xff] }
  0x2e   :  { %v2731_v5 = vsub.f32 %v37_v12, %v126_v63  ;;  %v1003_v37 = vand.u32 4294901760, %v74_v44  ;;  %2358 = vmatprep.subr.bf16.mxu0 %v3605_v53  ;;  %2169 = vmatprep.subr.bf16.mxu1 %v2717_v46  ;;  %v2735_v4 = vpack.c.bf16 %v129_v56, %v126_v63  ;;  %v2737_v52 = vsub.f32 %v38_v35, %v129_v56 }
  0x2f   :  { %3608 = vst [vmem:[#allocation27_spill] sm:$0xff] %v2725_v48  ;;  %v2739_v23 = vsub.f32 %v55_v40, %v180_v33  ;;  %v132_v29 = vand.u32 4294901760, %v39_v51  ;;  %v2741_v36 = vpack.c.bf16 %v183_v2, %v180_v33  ;;  %v2743_v12 = vsub.f32 %v56_v3, %v183_v2 }
  0x30   :  { %3609 = vst [vmem:[#allocation28_spill] sm:$0xff] %v2731_v5  ;;  %3610 = vst [vmem:[#allocation29_spill] sm:$0xff] %v2735_v4  ;;  %v2745_v31 = vpack.c.bf16 %v1003_v37, %v1000_v58  ;;  %v2747_v24 = vsub.f32 %v73_v10, %v1000_v58  ;;  %v42_v5 = vld [vmem:[#allocation2 + $0x78] sm:$0xff]  ;;  %v2749_v46 = vsub.f32 %v74_v44, %v1003_v37  ;;  %v135_v63 = vand.u32 4294901760, %v40_v59 }
  0x31   :  { %3611 = vst [vmem:[#allocation30_spill] sm:$0xff] %v2739_v23  ;;  %3612 = vst [vmem:[#allocation31_spill] sm:$0xff] %v2741_v36  ;;  %v2751_v35 = vsub.f32 %v39_v51, %v132_v29  ;;  %2360 = vmatpush3.bf16.msra.mxu0 %v2725_v48  ;;  %2171 = vmatpush3.bf16.msra.mxu1 %v2735_v4  ;;  %v186_v40 = vand.u32 4294901760, %v57_v13  ;;  %v189_v56 = vand.u32 4294901760, %v58_v41  ;;  %v138_v51 = vand.u32 4294901760, %v41_v17 }
  0x32   :  { %3613 = vst [vmem:[#allocation32_spill] sm:$0xff] %v2745_v31  ;;  %3614 = vst [vmem:[#allocation33_spill] sm:$0xff] %v2747_v24  ;;  %2361 = vmatprep.subr.bf16.mxu0 %v3605_v53  ;;  %2173 = vmatprep.subr.bf16.mxu1 %v2741_v36  ;;  %v2759_v10 = vpack.c.bf16 %v135_v63, %v132_v29  ;;  %v2761_v44 = vsub.f32 %v40_v59, %v135_v63  ;;  %v141_v2 = vand.u32 4294901760, %v42_v5  ;;  %v3502_v58 = vmov 0.0  }
  0x33   :  { %3615 = vst [vmem:[#allocation34_spill] sm:$0xff] %v2749_v46  ;;  %3616 = vst [vmem:[#allocation35_spill] sm:$0xff] %v2751_v35  ;;  %1970 = vmatprep.mubr.msk.f32.mxu0 %vm2565_vm0, %v3502_v58  ;;  %v2765_v37 = vpack.c.bf16 %v189_v56, %v186_v40  ;;  %v2767_v3 = vsub.f32 %v57_v13, %v186_v40  ;;  %v2769_v33 = vsub.f32 %v58_v41, %v189_v56 }
  0x34   :  { %3617 = vst [vmem:[#allocation36_spill] sm:$0xff] %v2759_v10  ;;  %3618 = vst [vmem:[#allocation37_spill] sm:$0xff] %v2761_v44  ;;  %v3622_v4 = vand.u32 4294901760, %v2603_v18  ;;  %v3623_v59 = vand.u32 4294901760, %v2605_v19  ;;  %v2777_v36 = vpack.c.bf16 %v141_v2, %v138_v51  ;;  %v2779_v48 = vsub.f32 %v41_v17, %v138_v51 }
  0x35   :  { %3619 = vst [vmem:[#allocation38_spill] sm:$0xff] %v2765_v37  ;;  %3620 = vst [vmem:[#allocation39_spill] sm:$0xff] %v2767_v3  ;;  %v2781_v44 = vsub.f32 %v42_v5, %v141_v2  ;;  %2363 = vmatpush3.bf16.msra.mxu0 %v2745_v31  ;;  %2175 = vmatpush3.bf16.msra.mxu1 %v2759_v10  ;;  %v3504_v13 = vand.u32 4294901760, %v2609_v25  ;;  %v3507_v40 = vand.u32 4294901760, %v2611_v26  ;;  %v3514_v17 = vand.u32 4294901760, %v2618_v32 }
  0x36   :  { %3621 = vst [vmem:[#allocation40_spill] sm:$0xff] %v2769_v33  ;;  %v1052_v29 = vsub.f32 %v2603_v18, %v3622_v4  ;;  %v1059_v63 = vsub.f32 %v2605_v19, %v3623_v59  ;;  %3624 = vst [vmem:[#allocation41_spill] sm:$0xff] %v2777_v36  ;;  %v3512_v4 = vand.u32 4294901760, %v2613_v27  ;;  %2364 = vmatprep.subr.bf16.mxu0 %v3605_v53  ;;  %2177 = vmatprep.subr.bf16.mxu1 %v2765_v37 }
  0x37   :  { %3625 = vst [vmem:[#allocation42_spill] sm:$0xff] %v2779_v48  ;;  %3626 = vst [vmem:[#allocation43_spill] sm:$0xff] %v2781_v44  ;;  %v3515_v5 = vand.u32 4294901760, %v2624_v42  ;;  %v323_v2 = vsub.f32 %v2609_v25, %v3504_v13  ;;  %v3628_v13 = vand.u32 4294901760, %v2626_v43 }
  0x38   :  { %v1053_v41 = vand.u32 4294901760, %v1052_v29  ;;  %v1060_v56 = vand.u32 4294901760, %v1059_v63  ;;  %v330_v29 = vsub.f32 %v2611_v26, %v3507_v40  ;;  %v1066_v59 = vsub.f32 %v2613_v27, %v3512_v4 }
  0x39   :  { %v1073_v63 = vsub.f32 %v2618_v32, %v3514_v17  ;;  %v211_v51 = vsub.f32 %v2624_v42, %v3515_v5  ;;  %v218_v37 = vsub.f32 %v2626_v43, %v3628_v13  ;;  %2179 = vmatpush3.bf16.msra.mxu1 %v2777_v36  ;;  %v324_v40 = vand.u32 4294901760, %v323_v2 }
  0x3a   :  { %v2802_v58 = vpack.c.bf16 %v1060_v56, %v1053_v41  ;;  %v331_v10 = vand.u32 4294901760, %v330_v29  ;;  %v1067_v31 = vand.u32 4294901760, %v1066_v59  ;;  %v3524_v41 = vand.u32 4294901760, %v2630_v49 }
  0x3b   :  { %v1074_v56 = vand.u32 4294901760, %v1073_v63  ;;  %v212_v4 = vand.u32 4294901760, %v211_v51  ;;  %v219_v53 = vand.u32 4294901760, %v218_v37  ;;  %v3522_v17 = vand.u32 4294901760, %v2632_v50 }
  0x3c   :  { %3627 = vst [vmem:[#allocation44_spill] sm:$0xff] %v2802_v58  ;;  %v2180_v58 = vpack.c.bf16 %v331_v10, %v324_v40  ;;  %v337_v5 = vsub.f32 %v2630_v49, %v3524_v41  ;;  %v3520_v42 = vand.u32 4294901760, %v2638_v54  ;;  %v3521_v13 = vand.u32 4294901760, %v2640_v55 }
  0x3d   :  { %v2821_v36 = vpack.c.bf16 %v1074_v56, %v1067_v31  ;;  %v2823_v2 = vpack.c.bf16 %v219_v53, %v212_v4  ;;  %v344_v51 = vsub.f32 %v2632_v50, %v3522_v17  ;;  %v3523_v37 = vand.u32 4294901760, %v2642_v57 }
  0x3e   :  { %2181 = vmatprep.subr.bf16.mxu1 %v2180_v58  ;;  %v338_v10 = vand.u32 4294901760, %v337_v5  ;;  %v1080_v40 = vsub.f32 %v2638_v54, %v3520_v42  ;;  %v1087_v29 = vsub.f32 %v2640_v55, %v3521_v13  ;;  %v3525_v31 = vand.u32 4294901760, %v2648_v1 }
  0x3f   :  { %3629 = vst [vmem:[#allocation45_spill] sm:$0xff] %v2821_v36  ;;  %3630 = vst [vmem:[#allocation46_spill] sm:$0xff] %v2823_v2  ;;  %v345_v53 = vand.u32 4294901760, %v344_v51  ;;  %v225_v4 = vsub.f32 %v2642_v57, %v3523_v37  ;;  %v3526_v59 = vand.u32 4294901760, %v2653_v8  ;;  %v3530_v58 = vand.u32 4294901760, %v2655_v9 }
  0x40   :  { %v1081_v5 = vand.u32 4294901760, %v1080_v40  ;;  %v1088_v63 = vand.u32 4294901760, %v1087_v29  ;;  %v232_v56 = vsub.f32 %v2648_v1, %v3525_v31  ;;  %v3528_v42 = vand.u32 4294901760, %v2661_v14 }
  0x41   :  { %v2845_v13 = vpack.c.bf16 %v345_v53, %v338_v10  ;;  %v226_v17 = vand.u32 4294901760, %v225_v4  ;;  %v351_v51 = vsub.f32 %v2653_v8, %v3526_v59  ;;  %v358_v37 = vsub.f32 %v2655_v9, %v3530_v58 }
  0x42   :  { %v2853_v41 = vpack.c.bf16 %v1088_v63, %v1081_v5  ;;  %v233_v40 = vand.u32 4294901760, %v232_v56  ;;  %v1094_v29 = vsub.f32 %v2661_v14, %v3528_v42  ;;  %v3527_v31 = vand.u32 4294901760, %v2663_v15 }
  0x43   :  { %3631 = vst [vmem:[#allocation47_spill] sm:$0xff] %v2845_v13  ;;  %v352_v10 = vand.u32 4294901760, %v351_v51  ;;  %v359_v53 = vand.u32 4294901760, %v358_v37  ;;  %v3529_v4 = vand.u32 4294901760, %v2669_v21  ;;  %v3531_v13 = vand.u32 4294901760, %v2671_v22 }
  0x44   :  { %3632 = vst [vmem:[#allocation48_spill] sm:$0xff] %v2853_v41  ;;  %v2861_v59 = vpack.c.bf16 %v233_v40, %v226_v17  ;;  %v1095_v2 = vand.u32 4294901760, %v1094_v29  ;;  %v1101_v5 = vsub.f32 %v2663_v15, %v3527_v31  ;;  %v3532_v63 = vand.u32 4294901760, %v2673_v30 }
  0x45   :  { %v2867_v56 = vpack.c.bf16 %v359_v53, %v352_v10  ;;  %v239_v51 = vsub.f32 %v2669_v21, %v3529_v4  ;;  %v246_v37 = vsub.f32 %v2671_v22, %v3531_v13  ;;  %v3533_v17 = vand.u32 4294901760, %v2677_v38 }
  0x46   :  { %3633 = vst [vmem:[#allocation49_spill] sm:$0xff] %v2861_v59  ;;  %v1102_v40 = vand.u32 4294901760, %v1101_v5  ;;  %v365_v29 = vsub.f32 %v2673_v30, %v3532_v63  ;;  %v3534_v31 = vand.u32 4294901760, %v2679_v39  ;;  %v3538_v10 = vand.u32 4294901760, %v2685_v47 }
  0x47   :  { %3634 = vst [vmem:[#allocation50_spill] sm:$0xff] %v2867_v56  ;;  %v240_v53 = vand.u32 4294901760, %v239_v51  ;;  %v247_v42 = vand.u32 4294901760, %v246_v37  ;;  %v372_v4 = vsub.f32 %v2677_v38, %v3533_v17  ;;  %v3536_v58 = vand.u32 4294901760, %v2691_v60 }
  0x48   :  { %v2885_v13 = vpack.c.bf16 %v1102_v40, %v1095_v2  ;;  %v366_v56 = vand.u32 4294901760, %v365_v29  ;;  %v1108_v5 = vsub.f32 %v2679_v39, %v3534_v31  ;;  %v1115_v63 = vsub.f32 %v2685_v47, %v3538_v10 }
  0x49   :  { %v2893_v59 = vpack.c.bf16 %v247_v42, %v240_v53  ;;  %v373_v51 = vand.u32 4294901760, %v372_v4  ;;  %v253_v37 = vsub.f32 %v2691_v60, %v3536_v58  ;;  %v3535_v17 = vand.u32 4294901760, %v2693_v61 }
  0x4a   :  { %3635 = vst [vmem:[#allocation51_spill] sm:$0xff] %v2885_v13  ;;  %v1109_v2 = vand.u32 4294901760, %v1108_v5  ;;  %v1116_v40 = vand.u32 4294901760, %v1115_v63  ;;  %v3537_v29 = vand.u32 4294901760, %v2695_v62  ;;  %v3539_v13 = vand.u32 4294901760, %v2699_v6 }
  0x4b   :  { %3636 = vst [vmem:[#allocation52_spill] sm:$0xff] %v2893_v59  ;;  %v2901_v31 = vpack.c.bf16 %v373_v51, %v366_v56  ;;  %v254_v41 = vand.u32 4294901760, %v253_v37  ;;  %v260_v42 = vsub.f32 %v2693_v61, %v3535_v17  ;;  %v3540_v4 = vand.u32 4294901760, %v2701_v28 }
  0x4c   :  { %v2907_v53 = vpack.c.bf16 %v1116_v40, %v1109_v2  ;;  %v379_v5 = vsub.f32 %v2695_v62, %v3537_v29  ;;  %v386_v63 = vsub.f32 %v2699_v6, %v3539_v13  ;;  %v3541_v56 = vand.u32 4294901760, %v2707_v20 }
  0x4d   :  { %3637 = vst [vmem:[#allocation53_spill] sm:$0xff] %v2901_v31  ;;  %v261_v51 = vand.u32 4294901760, %v260_v42  ;;  %v1122_v37 = vsub.f32 %v2701_v28, %v3540_v4  ;;  %v3542_v17 = vand.u32 4294901760, %v2709_v34  ;;  %v3543_v2 = vand.u32 4294901760, %v2715_v0 }
  0x4e   :  { %3638 = vst [vmem:[#allocation54_spill] sm:$0xff] %v2907_v53  ;;  %v380_v40 = vand.u32 4294901760, %v379_v5  ;;  %v387_v58 = vand.u32 4294901760, %v386_v63  ;;  %v1129_v29 = vsub.f32 %v2707_v20, %v3541_v56  ;;  %v3545_v10 = vand.u32 4294901760, %v2719_v11 }
  0x4f   :  { %v2925_v13 = vpack.c.bf16 %v261_v51, %v254_v41  ;;  %v1123_v53 = vand.u32 4294901760, %v1122_v37  ;;  %v267_v42 = vsub.f32 %v2709_v34, %v3542_v17  ;;  %v274_v4 = vsub.f32 %v2715_v0, %v3543_v2 }
  0x50   :  { %v2933_v31 = vpack.c.bf16 %v387_v58, %v380_v40  ;;  %v1130_v5 = vand.u32 4294901760, %v1129_v29  ;;  %v393_v63 = vsub.f32 %v2719_v11, %v3545_v10  ;;  %v3544_v56 = vand.u32 4294901760, %v2721_v45  ;;  %v3642_v29 = vld [vmem:[#allocation28_spill] sm:$0xff] }
  0x51   :  { %3639 = vst [vmem:[#allocation55_spill] sm:$0xff] %v2925_v13  ;;  %v268_v41 = vand.u32 4294901760, %v267_v42  ;;  %v275_v51 = vand.u32 4294901760, %v274_v4  ;;  %v3546_v37 = vand.u32 4294901760, %v2723_v7  ;;  %v3547_v13 = vand.u32 4294901760, %v2727_v16 }
  0x52   :  { %3640 = vst [vmem:[#allocation56_spill] sm:$0xff] %v2933_v31  ;;  %v2941_v17 = vpack.c.bf16 %v1130_v5, %v1123_v53  ;;  %v394_v59 = vand.u32 4294901760, %v393_v63  ;;  %v400_v58 = vsub.f32 %v2721_v45, %v3544_v56  ;;  %v3548_v40 = vand.u32 4294901760, %v3642_v29 }
  0x53   :  { %v2947_v2 = vpack.c.bf16 %v275_v51, %v268_v41  ;;  %v1136_v42 = vsub.f32 %v2723_v7, %v3546_v37  ;;  %v1143_v4 = vsub.f32 %v2727_v16, %v3547_v13  ;;  %v3549_v53 = vand.u32 4294901760, %v2737_v52 }
  0x54   :  { %3641 = vst [vmem:[#allocation57_spill] sm:$0xff] %v2941_v17  ;;  %v401_v5 = vand.u32 4294901760, %v400_v58  ;;  %v281_v63 = vsub.f32 %v3642_v29, %v3548_v40  ;;  %v3550_v56 = vand.u32 4294901760, %v2739_v23  ;;  %v3557_v41 = vand.u32 4294901760, %v2743_v12 }
  0x55   :  { %3643 = vst [vmem:[#allocation28_spill] sm:$0xff] %v2947_v2  ;;  %v1137_v51 = vand.u32 4294901760, %v1136_v42  ;;  %v1144_v10 = vand.u32 4294901760, %v1143_v4  ;;  %v288_v37 = vsub.f32 %v2737_v52, %v3549_v53  ;;  %v3554_v2 = vand.u32 4294901760, %v2747_v24 }
  0x56   :  { %v2965_v13 = vpack.c.bf16 %v401_v5, %v394_v59  ;;  %v282_v17 = vand.u32 4294901760, %v281_v63  ;;  %v407_v58 = vsub.f32 %v2739_v23, %v3550_v56  ;;  %v414_v40 = vsub.f32 %v2743_v12, %v3557_v41 }
  0x57   :  { %v2973_v31 = vpack.c.bf16 %v1144_v10, %v1137_v51  ;;  %v289_v42 = vand.u32 4294901760, %v288_v37  ;;  %v1150_v4 = vsub.f32 %v2747_v24, %v3554_v2  ;;  %v3553_v53 = vand.u32 4294901760, %v2749_v46  ;;  %v3651_v24 = vld [vmem:[#allocation44_spill] sm:$0xff] }
  0x58   :  { %3644 = vst [vmem:[#allocation58_spill] sm:$0xff] %v2965_v13  ;;  %v408_v59 = vand.u32 4294901760, %v407_v58  ;;  %v415_v5 = vand.u32 4294901760, %v414_v40  ;;  %v3555_v63 = vand.u32 4294901760, %v2751_v35  ;;  %v3645_v13 = vld [vmem:[#allocation37_spill] sm:$0xff]  ;;  %v3558_v37 = vand.u32 4294901760, %v2767_v3 }
  0x59   :  { %v3556_v36 = vand.u32 4294901760, %v3645_v13  ;;  %v2981_v56 = vpack.c.bf16 %v289_v42, %v282_v17  ;;  %v1151_v23 = vand.u32 4294901760, %v1150_v4  ;;  %v1157_v10 = vsub.f32 %v2749_v46, %v3553_v53 }
  0x5a   :  { %v2987_v51 = vpack.c.bf16 %v415_v5, %v408_v59  ;;  %v295_v58 = vsub.f32 %v2751_v35, %v3555_v63  ;;  %v3561_v17 = vand.u32 4294901760, %v2769_v33  ;;  %v421_v4 = vsub.f32 %v2767_v3, %v3558_v37 }
  0x5b   :  { %v302_v40 = vsub.f32 %v3645_v13, %v3556_v36  ;;  %v1158_v42 = vand.u32 4294901760, %v1157_v10  ;;  %v3562_v59 = vand.u32 4294901760, %v2779_v48  ;;  %v3563_v36 = vand.u32 4294901760, %v2781_v44 }
  0x5c   :  { %v296_v5 = vand.u32 4294901760, %v295_v58  ;;  %v428_v63 = vsub.f32 %v2769_v33, %v3561_v17  ;;  %v422_v10 = vand.u32 4294901760, %v421_v4 }
  0x5d   :  { %v303_v2 = vand.u32 4294901760, %v302_v40  ;;  %v3006_v41 = vpack.c.bf16 %v1158_v42, %v1151_v23  ;;  %v309_v37 = vsub.f32 %v2779_v48, %v3562_v59  ;;  %v316_v40 = vsub.f32 %v2781_v44, %v3563_v36  ;;  %v3646_v42 = vld [vmem:[#allocation13_spill] sm:$0xff] }
  0x5e   :  { %v429_v58 = vand.u32 4294901760, %v428_v63 }
  0x5f   :  { %v3013_v18 = vpack.c.bf16 %v303_v2, %v296_v5  ;;  %v310_v23 = vand.u32 4294901760, %v309_v37  ;;  %v317_v63 = vand.u32 4294901760, %v316_v40  ;;  %v75_v5 = vlaneseq }
  0x60   :  { %v3026_v2 = vpack.c.bf16 %v429_v58, %v422_v10  ;;  %v3649_v37 = vmov 0.0  }
  0x61   :  { %v3040_v58 = vpack.c.bf16 %v317_v63, %v310_v23  ;;  %v3647_v63 = vld [vmem:[#allocation30_spill] sm:$0xff]  ;;  %v3066_v10 = vand.u32 127, %v75_v5 }
  0x94   :  { %v3068_v53 = vpop.permute.xlu1 %90 }
  0x95   :  { %3648 = vst [vmem:[#allocation13_spill] sm:$0xff] %v3068_v53  ;;  %v3070_v23 = vpop.permute.xlu0 %84  ;;  %vm92_vm1 = vcmp.eq.s32.totalorder %v3066_v10, %v3068_v53  ;;  %v3711_v53 = vld [vmem:[#allocation18_spill] sm:$0xff] }
  0x96   :  { %vm86_vm2 = vcmp.eq.s32.totalorder %v3066_v10, %v3070_v23  ;;  %v1616_v4 = vsel %vm92_vm1, 1.0, %v3649_v37  ;;  %v3790_v23 = vld [vmem:[#allocation20_spill] sm:$0xff] }
  0x97   :  { %v1615_v5 = vsel %vm86_vm2, 1.0, %v3649_v37  ;;  %v3084_v59 = vsub.f32 %v1616_v4, %v1616_v4 }
  0x98   :  { %v3086_v36 = vsub.f32 %v1615_v5, %v1615_v5 }
  0x99   :  { %v3580_v48 = vand.u32 4294901760, %v3084_v59 }
  0x9a   :  { %v3088_v40 = vpop.permute.xlu0 %78  ;;  %v3579_v17 = vand.u32 4294901760, %v3086_v36 }
  0x9b   :  { %3650 = vst [vmem:[#allocation30_spill] sm:$0xff] %v3088_v40  ;;  %vm80_vm3 = vcmp.eq.s32.totalorder %v3066_v10, %v3088_v40  ;;  %v1041_v5 = vsub.f32 %v3084_v59, %v3580_v48  ;;  %v3707_v40 = vld [vmem:[#allocation14_spill] sm:$0xff] }
  0x9c   :  { %v1614_v44 = vsel %vm80_vm3, 1.0, %v3649_v37  ;;  %v194_v4 = vsub.f32 %v3086_v36, %v3579_v17  ;;  %v3652_v17 = vmov 0.0|0.0  }
  0x9d   :  { %v3104_v3 = vsub.f32 %v1614_v44, %v1614_v44  ;;  %v1042_v35 = vand.u32 4294901760, %v1041_v5  ;;  %v3653_v44 = vld [vmem:[#allocation45_spill] sm:$0xff]  ;;  %v3582_v5 = vmov 1.0  }
  0x9e   :  { %v195_v33 = vand.u32 4294901760, %v194_v4  ;;  %v3654_v4 = vld [vmem:[#allocation46_spill] sm:$0xff] }
  0x9f   :  { %v3581_v13 = vand.u32 4294901760, %v3104_v3  ;;  %1971 = vmatmul.mubr.f32.vlgmr.msra.gmra.mrb[0].mxu0 %v1042_v35  ;;  %v3656_v35 = vld [vmem:[#allocation48_spill] sm:$0xff] }
  0xa0   :  { %196 = vmatprep.mubr.f32.mxu1 %v195_v33  ;;  %2366 = vmatpush3.bf16.msra.mxu0 %v3651_v24  ;;  %v3655_v24 = vld [vmem:[#allocation47_spill] sm:$0xff]  ;;  %v3657_v33 = vld [vmem:[#allocation49_spill] sm:$0xff] }
  0xa1   :  { %v200_v46 = vsub.f32 %v3104_v3, %v3581_v13  ;;  %2005 = vmatprep.mubr.msk.f32.mxu0 %vm2565_vm0, %v3649_v37  ;;  %2367 = vmatprep.subr.bf16.mxu0 %v3652_v17  ;;  %v3662_v13 = vld [vmem:[#allocation54_spill] sm:$0xff] }
  0xa3   :  { %v201_v48 = vand.u32 4294901760, %v200_v46  ;;  %v3658_v46 = vld [vmem:[#allocation50_spill] sm:$0xff] }
  0xa4   :  { %2369 = vmatpush3.bf16.msra.mxu0 %v3653_v44  ;;  %v3660_v44 = vld [vmem:[#allocation52_spill] sm:$0xff] }
  0xa5   :  { %202 = vmatmul.mubr.f32.vlgmr.msra.gmra.mrb[0].mxu1 %v201_v48  ;;  %2370 = vmatprep.subr.bf16.mxu0 %v3652_v17  ;;  %v3659_v48 = vld [vmem:[#allocation51_spill] sm:$0xff] }
  0xa6   :  { %2183 = vmatpush3.bf16.msra.mxu1 %v3654_v4  ;;  %1617 = vmatprep.mubr.msk.f32.mxu1 %vm86_vm2, %v3582_v5  ;;  %v3661_v4 = vld [vmem:[#allocation53_spill] sm:$0xff]  ;;  %v3663_v5 = vld [vmem:[#allocation55_spill] sm:$0xff] }
  0xa7   :  { %2185 = vmatprep.subr.bf16.mxu1 %v3655_v24  ;;  %v3664_v24 = vld [vmem:[#allocation56_spill] sm:$0xff] }
  0xa8   :  { %2372 = vmatpush3.bf16.msra.mxu0 %v3656_v35  ;;  %v3665_v35 = vld [vmem:[#allocation57_spill] sm:$0xff] }
  0xa9   :  { %2373 = vmatprep.subr.bf16.mxu0 %v3652_v17 }
  0xaa   :  { %2187 = vmatpush3.bf16.msra.mxu1 %v3657_v33  ;;  %v3666_v33 = vld [vmem:[#allocation28_spill] sm:$0xff] }
  0xab   :  { %2189 = vmatprep.subr.bf16.mxu1 %v3658_v46  ;;  %v3667_v46 = vld [vmem:[#allocation58_spill] sm:$0xff] }
  0xac   :  { %2375 = vmatpush3.bf16.msra.mxu0 %v3659_v48  ;;  %v3677_v48 = vpack.c.bf16 %v2655_v9, %v2653_v8 }
  0xad   :  { %2376 = vmatprep.subr.bf16.mxu0 %v3652_v17 }
  0xae   :  { %2191 = vmatpush3.bf16.msra.mxu1 %v3660_v44  ;;  %v3678_v44 = vpack.c.bf16 %v2663_v15, %v2661_v14 }
  0xaf   :  { %2193 = vmatprep.subr.bf16.mxu1 %v3661_v4  ;;  %v3679_v4 = vpack.c.bf16 %v2671_v22, %v2669_v21 }
  0xb0   :  { %2378 = vmatpush3.bf16.msra.mxu0 %v3662_v13  ;;  %v3668_v13 = vmov 1.0  }
  0xb1   :  { %2379 = vmatprep.subr.bf16.mxu0 %v3652_v17 }
  0xb2   :  { %2195 = vmatpush3.bf16.msra.mxu1 %v3663_v5  ;;  %v3676_v5 = vpack.c.bf16 %v2648_v1, %v2642_v57 }
  0xb3   :  { %2197 = vmatprep.subr.bf16.mxu1 %v3664_v24  ;;  %v3680_v24 = vpack.c.bf16 %v2677_v38, %v2673_v30 }
  0xb4   :  { %2381 = vmatpush3.bf16.msra.mxu0 %v3665_v35  ;;  %v3681_v35 = vpack.c.bf16 %v2685_v47, %v2679_v39 }
  0xb5   :  { %2382 = vmatprep.subr.bf16.mxu0 %v3652_v17 }
  0xb6   :  { %2199 = vmatpush3.bf16.msra.mxu1 %v3666_v33  ;;  %v3682_v33 = vpack.c.bf16 %v2693_v61, %v2691_v60 }
  0xb7   :  { %2201 = vmatprep.subr.bf16.mxu1 %v3667_v46  ;;  %v3683_v46 = vpack.c.bf16 %v2699_v6, %v2695_v62 }
  0xb8   :  { %2384 = vmatpush3.bf16.msra.mxu0 %v2973_v31  ;;  %v3669_v31 = vld [vmem:[#allocation9_spill] sm:$0xff] }
  0xb9   :  { %2385 = vmatprep.subr.bf16.mxu0 %v3652_v17 }
  0xba   :  { %2203 = vmatpush3.bf16.msra.mxu1 %v2981_v56  ;;  %v3670_v56 = vpack.c.bf16 %v2605_v19, %v3669_v31 }
  0xbb   :  { %2205 = vmatprep.subr.bf16.mxu1 %v2987_v51  ;;  %v3673_v51 = vpack.c.bf16 %v2626_v43, %v3646_v42 }
  0xbc   :  { %2387 = vmatpush3.bf16.msra.mxu0 %v3006_v41  ;;  %v3672_v41 = vpack.c.bf16 %v2618_v32, %v2613_v27 }
  0xbd   :  { %2388 = vmatprep.subr.bf16.mxu0 %v3652_v17 }
  0xbe   :  { %2207 = vmatpush3.bf16.msra.mxu1 %v3013_v18  ;;  %v3671_v18 = vpack.c.bf16 %v2611_v26, %v2609_v25 }
  0xbf   :  { %2209 = vmatprep.subr.bf16.mxu1 %v3026_v2  ;;  %2006 = vmatmul.mubr.msk.f32.vlgmr.msra.gmra.mrb[0].mxu0 %vm92_vm1, %v3668_v13  ;;  %v3674_v2 = vpack.c.bf16 %v2632_v50, %v2630_v49 }
  0xc0   :  { %2390 = vmatpush3.bf16.msra.mxu0 %v3670_v56  ;;  %2040 = vmatprep.mubr.msk.f32.mxu0 %vm2565_vm0, %v3649_v37  ;;  %v3684_v56 = vpack.c.bf16 %v2707_v20, %v2701_v28 }
  0xc1   :  { %2391 = vmatprep.subr.bf16.mxu0 %v3652_v17 }
  0xc2   :  { %2211 = vmatpush3.bf16.msra.mxu1 %v3040_v58  ;;  %v3675_v58 = vpack.c.bf16 %v2640_v55, %v2638_v54 }
  0xc3   :  { %2213 = vmatprep.subr.bf16.mxu1 %v3671_v18  ;;  %v3685_v18 = vpack.c.bf16 %v2715_v0, %v2709_v34 }
  0xc4   :  { %2393 = vmatpush3.bf16.msra.mxu0 %v3672_v41  ;;  %v3686_v41 = vpack.c.bf16 %v2721_v45, %v2719_v11 }
  0xc5   :  { %1618 = vmatmul.mubr.msk.f32.vlgmr.msra.gmra.mrb[2].mxu1 %vm80_vm3, %v3668_v13  ;;  %2394 = vmatprep.subr.bf16.mxu0 %v3652_v17 }
  0xc6   :  { %2215 = vmatpush3.bf16.msra.mxu1 %v3673_v51  ;;  %569 = vmatprep.mubr.f32.mxu1 %v3086_v36  ;;  %v3687_v51 = vpack.c.bf16 %v2727_v16, %v2723_v7 }
  0xc7   :  { %2217 = vmatprep.subr.bf16.mxu1 %v3674_v2  ;;  %v3688_v2 = vpack.c.bf16 %v2737_v52, %v3642_v29 }
  0xc8   :  { %2396 = vmatpush3.bf16.msra.mxu0 %v3675_v58  ;;  %v3689_v58 = vpack.c.bf16 %v2743_v12, %v3647_v63 }
  0xc9   :  { %2397 = vmatprep.subr.bf16.mxu0 %v3652_v17 }
  0xca   :  { %2219 = vmatpush3.bf16.msra.mxu1 %v3676_v5  ;;  %v3690_v5 = vld [vmem:[#allocation34_spill] sm:$0xff] }
  0xcb   :  { %2221 = vmatprep.subr.bf16.mxu1 %v3677_v48  ;;  %v3691_v48 = vld [vmem:[#allocation33_spill] sm:$0xff] }
  0xcc   :  { %2399 = vmatpush3.bf16.msra.mxu0 %v3678_v44  ;;  %v3692_v44 = vpack.c.bf16 %v3690_v5, %v3691_v48 }
  0xcd   :  { %2400 = vmatprep.subr.bf16.mxu0 %v3652_v17 }
  0xce   :  { %2223 = vmatpush3.bf16.msra.mxu1 %v3679_v4  ;;  %v3693_v4 = vld [vmem:[#allocation37_spill] sm:$0xff] }
  0xcf   :  { %2225 = vmatprep.subr.bf16.mxu1 %v3680_v24  ;;  %v3694_v24 = vld [vmem:[#allocation35_spill] sm:$0xff] }
  0xd0   :  { %2402 = vmatpush3.bf16.msra.mxu0 %v3681_v35  ;;  %v3695_v35 = vpack.c.bf16 %v3693_v4, %v3694_v24 }
  0xd1   :  { %2403 = vmatprep.subr.bf16.mxu0 %v3652_v17 }
  0xd2   :  { %2227 = vmatpush3.bf16.msra.mxu1 %v3682_v33  ;;  %v3696_v33 = vld [vmem:[#allocation40_spill] sm:$0xff] }
  0xd3   :  { %2229 = vmatprep.subr.bf16.mxu1 %v3683_v46  ;;  %v3697_v46 = vld [vmem:[#allocation39_spill] sm:$0xff] }
  0xd4   :  { %2405 = vmatpush3.bf16.msra.mxu0 %v3684_v56  ;;  %v3698_v56 = vpack.c.bf16 %v3696_v33, %v3697_v46 }
  0xd5   :  { %2406 = vmatprep.subr.bf16.mxu0 %v3652_v17 }
  0xd6   :  { %2231 = vmatpush3.bf16.msra.mxu1 %v3685_v18  ;;  %v3699_v18 = vld [vmem:[#allocation8_spill] sm:$0xff] }
  0xd7   :  { %2233 = vmatprep.subr.bf16.mxu1 %v3686_v41  ;;  %v3700_v41 = vld [vmem:[#allocation43_spill] sm:$0xff] }
  0xd8   :  { %2408 = vmatpush3.bf16.msra.mxu0 %v3687_v51  ;;  %v3701_v51 = vld [vmem:[#allocation42_spill] sm:$0xff] }
  0xd9   :  { %2409 = vmatprep.subr.bf16.mxu0 %v3652_v17 }
  0xda   :  { %2235 = vmatpush3.bf16.msra.mxu1 %v3688_v2  ;;  %v3702_v2 = vpack.c.bf16 %v3700_v41, %v3701_v51 }
  0xdb   :  { %2237 = vmatprep.subr.bf16.mxu1 %v3689_v58  ;;  %v3703_v58 = vld [vmem:[#allocation10_spill] sm:$0xff] }
  0xdc   :  { %2411 = vmatpush3.bf16.msra.mxu0 %v3692_v44  ;;  %v3704_v44 = vld [vmem:[#allocation11_spill] sm:$0xff] }
  0xdd   :  { %2412 = vmatprep.subr.bf16.mxu0 %v3652_v17 }
  0xde   :  { %2239 = vmatpush3.bf16.msra.mxu1 %v3695_v35  ;;  %v3705_v35 = vld [vmem:[#allocation12_spill] sm:$0xff] }
  0xdf   :  { %2241 = vmatprep.subr.bf16.mxu1 %v3698_v56  ;;  %2041 = vmatmul.mubr.f32.vlgmr.msra.gmra.mrb[0].mxu0 %v3084_v59  ;;  %v3706_v56 = vand.u32 4294901760, %v3086_v36  ;;  %v3713_v36 = vld [vmem:[#allocation20_spill] sm:$0xff] }
  0xe0   :  { %2414 = vmatpush3.bf16.msra.mxu0 %v3699_v18  ;;  %2075 = vmatprep.mubr.msk.f32.mxu0 %vm2565_vm0, %v3649_v37  ;;  %v3708_v18 = vld [vmem:[#allocation15_spill] sm:$0xff] }
  0xe1   :  { %2415 = vmatprep.subr.bf16.mxu0 %v3652_v17 }
  0xe2   :  { %2243 = vmatpush3.bf16.msra.mxu1 %v3702_v2  ;;  %v3709_v2 = vld [vmem:[#allocation16_spill] sm:$0xff] }
  0xe3   :  { %2245 = vmatprep.subr.bf16.mxu1 %v3703_v58  ;;  %v3710_v58 = vld [vmem:[#allocation17_spill] sm:$0xff] }
  0xe4   :  { %2417 = vmatpush3.bf16.msra.mxu0 %v3704_v44  ;;  %v3712_v44 = vld [vmem:[#allocation19_spill] sm:$0xff] }
  0xe5   :  { %572 = vmatmul.mubr.f32.vlgmr.msra.gmra.mrb[4].mxu1 %v3104_v3  ;;  %2418 = vmatprep.subr.bf16.mxu0 %v3652_v17 }
  0xe6   :  { %2247 = vmatpush3.bf16.msra.mxu1 %v3705_v35  ;;  %676 = vmatprep.mubr.f32.mxu1 %v3706_v56  ;;  %v3714_v56 = vld [vmem:[#allocation21_spill] sm:$0xff]  ;;  %v3715_v35 = vld [vmem:[#allocation22_spill] sm:$0xff] }
  0xe7   :  { %2249 = vmatprep.subr.bf16.mxu1 %v3707_v40  ;;  %v3718_v40 = vld [vmem:[#allocation25_spill] sm:$0xff] }
  0xe8   :  { %2420 = vmatpush3.bf16.msra.mxu0 %v3708_v18  ;;  %v3716_v18 = vld [vmem:[#allocation23_spill] sm:$0xff] }
  0xe9   :  { %2421 = vmatprep.subr.bf16.mxu0 %v3652_v17 }
  0xea   :  { %2251 = vmatpush3.bf16.msra.mxu1 %v3709_v2  ;;  %v3717_v2 = vld [vmem:[#allocation24_spill] sm:$0xff] }
  0xeb   :  { %2253 = vmatprep.subr.bf16.mxu1 %v3710_v58  ;;  %v3721_v58 = vld [vmem:[#allocation29_spill] sm:$0xff] }
  0xec   :  { %2423 = vmatpush3.bf16.msra.mxu0 %v3711_v53  ;;  %v3719_v53 = vld [vmem:[#allocation26_spill] sm:$0xff] }
  0xed   :  { %2424 = vmatprep.subr.bf16.mxu0 %v3652_v17 }
  0xee   :  { %2255 = vmatpush3.bf16.msra.mxu1 %v3712_v44  ;;  %v3720_v44 = vld [vmem:[#allocation27_spill] sm:$0xff] }
  0xef   :  { %2257 = vmatprep.subr.bf16.mxu1 %v3713_v36 }
  0xf0   :  { %2426 = vmatpush3.bf16.msra.mxu0 %v3714_v56  ;;  %v3722_v56 = vld [vmem:[#allocation31_spill] sm:$0xff] }
  0xf1   :  { %2427 = vmatprep.subr.bf16.mxu0 %v3652_v17 }
  0xf2   :  { %2259 = vmatpush3.bf16.msra.mxu1 %v3715_v35  ;;  %v3723_v35 = vld [vmem:[#allocation32_spill] sm:$0xff] }
  0xf3   :  { %2261 = vmatprep.subr.bf16.mxu1 %v3716_v18  ;;  %v3724_v18 = vand.u32 4294901760, %v3669_v31  ;;  %v3731_v31 = vand.u32 4294901760, %v2613_v27  ;;  %v3737_v27 = vand.u32 4294901760, %v2632_v50 }
  0xf4   :  { %2429 = vmatpush3.bf16.msra.mxu0 %v3717_v2  ;;  %v3725_v2 = vand.u32 4294901760, %v2605_v19  ;;  %v3732_v19 = vand.u32 4294901760, %v2618_v32  ;;  %v3738_v32 = vand.u32 4294901760, %v3104_v3  ;;  %v3743_v3 = vand.u32 4294901760, %v2653_v8 }
  0xf5   :  { %2430 = vmatprep.subr.bf16.mxu0 %v3652_v17  ;;  %v3749_v8 = vand.u32 4294901760, %v2673_v30  ;;  %v3755_v30 = vand.u32 4294901760, %v2695_v62  ;;  %v3761_v62 = vand.u32 4294901760, %v2719_v11  ;;  %v3767_v11 = vand.u32 4294901760, %v3647_v63 }
  0xf6   :  { %2263 = vmatpush3.bf16.msra.mxu1 %v3718_v40  ;;  %v2437_v36 = vpack.c.bf16 %v3725_v2, %v3724_v18  ;;  %v3726_v40 = vld [vmem:[#allocation36_spill] sm:$0xff]  ;;  %v2440_v18 = vpack.c.bf16 %v3732_v19, %v3731_v31  ;;  %v3733_v2 = vld [vmem:[#allocation41_spill] sm:$0xff]  ;;  %v3773_v63 = vand.u32 4294901760, %v3697_v46 }
  0xf7   :  { %2265 = vmatprep.subr.bf16.mxu1 %v3719_v53  ;;  %v3727_v53 = vld [vmem:[#allocation38_spill] sm:$0xff] }
  0xf8   :  { %2432 = vmatpush3.bf16.msra.mxu0 %v3720_v44  ;;  %v3728_v44 = vand.u32 4294901760, %v2609_v25  ;;  %v3734_v25 = vand.u32 4294901760, %v3646_v42  ;;  %v3745_v42 = vand.u32 4294901760, %v2661_v14  ;;  %v3751_v14 = vand.u32 4294901760, %v2679_v39 }
  0xf9   :  { %2433 = vmatprep.subr.bf16.mxu0 %v3652_v17  ;;  %v3757_v39 = vand.u32 4294901760, %v2701_v28  ;;  %v3763_v28 = vand.u32 4294901760, %v2723_v7  ;;  %v3769_v7 = vand.u32 4294901760, %v3691_v48  ;;  %v3776_v48 = vld [vmem:[#allocation43_spill] sm:$0xff] }
  0xfa   :  { %2267 = vmatpush3.bf16.msra.mxu1 %v3721_v58  ;;  %v3729_v58 = vand.u32 4294901760, %v2611_v26  ;;  %v3735_v26 = vand.u32 4294901760, %v2626_v43  ;;  %v3741_v43 = vand.u32 4294901760, %v2642_v57  ;;  %v3747_v57 = vand.u32 4294901760, %v2669_v21 }
  0xfb   :  { %2269 = vmatprep.subr.bf16.mxu1 %v3722_v56  ;;  %v3730_v56 = vand.u32 4294901760, %v3084_v59  ;;  %v3736_v59 = vand.u32 4294901760, %v2630_v49  ;;  %v3742_v49 = vand.u32 4294901760, %v2648_v1  ;;  %v3748_v1 = vand.u32 4294901760, %v2671_v22 }
  0xfc   :  { %2435 = vmatpush3.bf16.msra.mxu0 %v3723_v35  ;;  %v2276_v41 = vpack.c.bf16 %v3729_v58, %v3728_v44  ;;  %v2278_v58 = vpack.c.bf16 %v3735_v26, %v3734_v25  ;;  %v3753_v21 = vand.u32 4294901760, %v2691_v60  ;;  %v3754_v22 = vand.u32 4294901760, %v2693_v61 }
  0xfd   :  { %2436 = vmatprep.subr.bf16.mxu0 %v3652_v17  ;;  %v2280_v44 = vpack.c.bf16 %v3737_v27, %v3736_v59  ;;  %v2282_v50 = vpack.c.bf16 %v3742_v49, %v3741_v43  ;;  %v3759_v60 = vand.u32 4294901760, %v2709_v34  ;;  %v3760_v61 = vand.u32 4294901760, %v2715_v0 }
  0xfe   :  { %2271 = vmatpush3.bf16.msra.mxu1 %v3726_v40  ;;  %v3765_v34 = vand.u32 4294901760, %v3642_v29  ;;  %v3766_v0 = vand.u32 4294901760, %v2737_v52  ;;  %v3771_v29 = vand.u32 4294901760, %v3694_v24  ;;  %v3772_v52 = vand.u32 4294901760, %v3693_v4  ;;  %v3779_v24 = vld [vmem:[#allocation8_spill] sm:$0xff] }
  0xff   :  { %2273 = vmatprep.subr.bf16.mxu1 %v3727_v53  ;;  %2076 = vmatmul.mubr.f32.vlgmr.msra.gmra.mrb[0].mxu0 %v3730_v56  ;;  %v3740_v56 = vand.u32 4294901760, %v2640_v55 }
 0x100   :  { %2438 = vmatpush3.bf16.msra.mxu0 %v2437_v36  ;;  %2110 = vmatprep.mubr.msk.f32.mxu0 %vm2565_vm0, %v3649_v37  ;;  %v3739_v36 = vand.u32 4294901760, %v2638_v54  ;;  %v3744_v54 = vand.u32 4294901760, %v2655_v9  ;;  %v3750_v9 = vand.u32 4294901760, %v2677_v38  ;;  %v3756_v38 = vand.u32 4294901760, %v2699_v6 }
 0x101   :  { %2439 = vmatprep.subr.bf16.mxu0 %v3652_v17  ;;  %v3762_v6 = vand.u32 4294901760, %v2721_v45  ;;  %v3768_v45 = vand.u32 4294901760, %v2743_v12  ;;  %v2302_v49 = vpack.c.bf16 %v3772_v52, %v3771_v29  ;;  %v3774_v12 = vand.u32 4294901760, %v3696_v33  ;;  %v3780_v33 = vld [vmem:[#allocation10_spill] sm:$0xff] }
 0x102   :  { %2275 = vmatpush3.bf16.msra.mxu1 %v3733_v2  ;;  %v2443_v31 = vpack.c.bf16 %v3740_v56, %v3739_v36  ;;  %v2284_v55 = vpack.c.bf16 %v3744_v54, %v3743_v3  ;;  %v2288_v25 = vpack.c.bf16 %v3750_v9, %v3749_v8  ;;  %v2292_v59 = vpack.c.bf16 %v3756_v38, %v3755_v30  ;;  %v3792_v8 = vld [vmem:[#allocation22_spill] sm:$0xff]  ;;  %v3793_v9 = vld [vmem:[#allocation23_spill] sm:$0xff] }
 0x103   :  { %2277 = vmatprep.subr.bf16.mxu1 %v2276_v41  ;;  %v3746_v41 = vand.u32 4294901760, %v2663_v15  ;;  %v3752_v15 = vand.u32 4294901760, %v2685_v47  ;;  %v3758_v47 = vand.u32 4294901760, %v2707_v20  ;;  %v3764_v20 = vand.u32 4294901760, %v2727_v16 }
 0x104   :  { %2441 = vmatpush3.bf16.msra.mxu0 %v2440_v18  ;;  %v2286_v18 = vpack.c.bf16 %v3748_v1, %v3747_v57  ;;  %v2298_v56 = vpack.c.bf16 %v3766_v0, %v3765_v34  ;;  %v3770_v16 = vand.u32 4294901760, %v3690_v5  ;;  %v3775_v5 = vand.u32 4294901760, %v3701_v51  ;;  %v3782_v51 = vld [vmem:[#allocation11_spill] sm:$0xff]  ;;  %v3788_v57 = vld [vmem:[#allocation18_spill] sm:$0xff] }
 0x105   :  { %680 = vmatmul.mubr.f32.vlgmr.msra.gmra.mrb[6].mxu1 %v3738_v32  ;;  %2442 = vmatprep.subr.bf16.mxu0 %v3652_v17  ;;  %v2446_v19 = vpack.c.bf16 %v3746_v41, %v3745_v42  ;;  %v2449_v26 = vpack.c.bf16 %v3752_v15, %v3751_v14  ;;  %v2452_v27 = vpack.c.bf16 %v3758_v47, %v3757_v39  ;;  %v3777_v3 = vand.u32 4294901760, %v3776_v48  ;;  %v3785_v42 = vld [vmem:[#allocation15_spill] sm:$0xff]  ;;  %v3786_v41 = vld [vmem:[#allocation16_spill] sm:$0xff]  ;;  %v3795_v14 = vld [vmem:[#allocation25_spill] sm:$0xff] }
 0x106   :  { %2279 = vmatpush3.bf16.msra.mxu1 %v2278_v58  ;;  %1619 = vmatprep.mubr.msk.f32.mxu1 %vm86_vm2, %v3668_v13  ;;  %v2290_v58 = vpack.c.bf16 %v3754_v22, %v3753_v21  ;;  %v2296_v32 = vpack.c.bf16 %v3762_v6, %v3761_v62  ;;  %v2455_v36 = vpack.c.bf16 %v3764_v20, %v3763_v28  ;;  %v3789_v1 = vld [vmem:[#allocation19_spill] sm:$0xff]  ;;  %v3796_v15 = vld [vmem:[#allocation26_spill] sm:$0xff]  ;;  %v3798_v21 = vld [vmem:[#allocation29_spill] sm:$0xff] }
 0x107   :  { %2281 = vmatprep.subr.bf16.mxu1 %v2280_v44  ;;  %v2294_v44 = vpack.c.bf16 %v3760_v61, %v3759_v60  ;;  %v2458_v43 = vpack.c.bf16 %v3770_v16, %v3769_v7  ;;  %v2306_v54 = vpack.c.bf16 %v3777_v3, %v3775_v5  ;;  %v3799_v22 = vld [vmem:[#allocation31_spill] sm:$0xff] }
 0x108   :  { %2444 = vmatpush3.bf16.msra.mxu0 %v2443_v31  ;;  %v2300_v31 = vpack.c.bf16 %v3768_v45, %v3767_v11 }
 0x109   :  { %2445 = vmatprep.subr.bf16.mxu0 %v3652_v17 }
 0x10a   :  { %2283 = vmatpush3.bf16.msra.mxu1 %v2282_v50  ;;  %v2304_v50 = vpack.c.bf16 %v3774_v12, %v3773_v63 }
 0x10b   :  { %2285 = vmatprep.subr.bf16.mxu1 %v2284_v55  ;;  %v3783_v55 = vld [vmem:[#allocation12_spill] sm:$0xff] }
 0x10c   :  { %2447 = vmatpush3.bf16.msra.mxu0 %v2446_v19  ;;  %v3787_v19 = vld [vmem:[#allocation17_spill] sm:$0xff] }
 0x10d   :  { %2448 = vmatprep.subr.bf16.mxu0 %v3652_v17 }
 0x10e   :  { %2287 = vmatpush3.bf16.msra.mxu1 %v2286_v18  ;;  %v3791_v18 = vld [vmem:[#allocation21_spill] sm:$0xff] }
 0x10f   :  { %2289 = vmatprep.subr.bf16.mxu1 %v2288_v25  ;;  %v3794_v25 = vld [vmem:[#allocation24_spill] sm:$0xff] }
 0x110   :  { %2450 = vmatpush3.bf16.msra.mxu0 %v2449_v26  ;;  %v3797_v26 = vld [vmem:[#allocation27_spill] sm:$0xff] }
 0x111   :  { %2451 = vmatprep.subr.bf16.mxu0 %v3652_v17 }
 0x112   :  { %2291 = vmatpush3.bf16.msra.mxu1 %v2290_v58 }
 0x113   :  { %2293 = vmatprep.subr.bf16.mxu1 %v2292_v59 }
 0x114   :  { %2453 = vmatpush3.bf16.msra.mxu0 %v2452_v27 }
 0x115   :  { %2454 = vmatprep.subr.bf16.mxu0 %v3652_v17 }
 0x116   :  { %2295 = vmatpush3.bf16.msra.mxu1 %v2294_v44 }
 0x117   :  { %2297 = vmatprep.subr.bf16.mxu1 %v2296_v32 }
 0x118   :  { %2456 = vmatpush3.bf16.msra.mxu0 %v2455_v36 }
 0x119   :  { %2457 = vmatprep.subr.bf16.mxu0 %v3652_v17 }
 0x11a   :  { %2299 = vmatpush3.bf16.msra.mxu1 %v2298_v56 }
 0x11b   :  { %2301 = vmatprep.subr.bf16.mxu1 %v2300_v31 }
 0x11c   :  { %2459 = vmatpush3.bf16.msra.mxu0 %v2458_v43 }
 0x11d   :  { %2460 = vmatprep.subr.bf16.mxu0 %v3652_v17 }
 0x11e   :  { %2303 = vmatpush3.bf16.msra.mxu1 %v2302_v49 }
 0x11f   :  { %2305 = vmatprep.subr.bf16.mxu1 %v2304_v50  ;;  %2111 = vmatmul.mubr.msk.f32.vlgmr.msra.gmra.mrb[0].mxu0 %vm92_vm1, %v3668_v13 }
 0x120   :  { %2462 = vmatpush3.bf16.msra.mxu0 %v3779_v24  ;;  %2145 = vmatprep.mubr.msk.f32.mxu0 %vm2565_vm0, %v3649_v37  ;;  %v3784_v37 = vld [vmem:[#allocation14_spill] sm:$0xff] }
 0x121   :  { %2463 = vmatprep.subr.bf16.mxu0 %v3652_v17 }
 0x122   :  { %2307 = vmatpush3.bf16.msra.mxu1 %v2306_v54 }
 0x123   :  { %2309 = vmatprep.subr.bf16.mxu1 %v3780_v33 }
 0x124   :  { %2465 = vmatpush3.bf16.msra.mxu0 %v3782_v51 }
 0x125   :  { %1620 = vmatmul.mubr.msk.f32.vlgmr.msra.gmra.mrb[8].mxu1 %vm80_vm3, %v3668_v13  ;;  %2466 = vmatprep.subr.bf16.mxu0 %v3652_v17 }
 0x126   :  { %2311 = vmatpush3.bf16.msra.mxu1 %v3783_v55  ;;  %1621 = vmatprep.mubr.msk.f32.mxu1 %vm86_vm2, %v3668_v13 }
 0x127   :  { %2313 = vmatprep.subr.bf16.mxu1 %v3784_v37 }
 0x128   :  { %2468 = vmatpush3.bf16.msra.mxu0 %v3785_v42 }
 0x129   :  { %2469 = vmatprep.subr.bf16.mxu0 %v3652_v17 }
 0x12a   :  { %2315 = vmatpush3.bf16.msra.mxu1 %v3786_v41 }
 0x12b   :  { %2317 = vmatprep.subr.bf16.mxu1 %v3787_v19 }
 0x12c   :  { %2471 = vmatpush3.bf16.msra.mxu0 %v3788_v57 }
 0x12d   :  { %2472 = vmatprep.subr.bf16.mxu0 %v3652_v17 }
 0x12e   :  { %2319 = vmatpush3.bf16.msra.mxu1 %v3789_v1 }
 0x12f   :  { %2321 = vmatprep.subr.bf16.mxu1 %v3790_v23 }
 0x130   :  { %2474 = vmatpush3.bf16.msra.mxu0 %v3791_v18 }
 0x131   :  { %2475 = vmatprep.subr.bf16.mxu0 %v3652_v17 }
 0x132   :  { %2323 = vmatpush3.bf16.msra.mxu1 %v3792_v8 }
 0x133   :  { %2325 = vmatprep.subr.bf16.mxu1 %v3793_v9 }
 0x134   :  { %2477 = vmatpush3.bf16.msra.mxu0 %v3794_v25 }
 0x135   :  { %2478 = vmatprep.subr.bf16.mxu0 %v3652_v17 }
 0x136   :  { %2327 = vmatpush3.bf16.msra.mxu1 %v3795_v14 }
 0x137   :  { %2329 = vmatprep.subr.bf16.mxu1 %v3796_v15 }
 0x138   :  { %2480 = vmatpush3.bf16.msra.mxu0 %v3797_v26 }
 0x139   :  { %2481 = vmatprep.subr.bf16.mxu0 %v3652_v17 }
 0x13a   :  { %2331 = vmatpush3.bf16.msra.mxu1 %v3798_v21 }
 0x13b   :  { %2333 = vmatprep.subr.bf16.mxu1 %v3799_v22 }
 0x13c   :  { %2483 = vmatpush3.bf16.msra.mxu0 %v3723_v35 }
 0x13e   :  { %2335 = vmatpush3.bf16.msra.mxu1 %v3726_v40 }
 0x13f   :  { %2337 = vmatprep.subr.bf16.mxu1 %v3727_v53  ;;  %2146 = vmatmul.mubr.msk.f32.vlgmr.msra.gmra.mrb[0].mxu0 %vm92_vm1, %v3668_v13 }
 0x142   :  { %2339 = vmatpush3.bf16.msra.mxu1 %v3733_v2 }
 0x145   :  { %1622 = vmatmul.mubr.msk.f32.vlgmr.msra.gmra.mrb[10].mxu1 %vm80_vm3, %v3668_v13 }
 0x178   :  { %v1658_v17 = vpop.f32.mrb[0].mxu1 }
 0x179   :  { %v1659_v58 = vpop.f32.mrb[1].mxu1 }
 0x17a   :  { %v1660_v30 = vadd.f32 %v1659_v58, %v1658_v17 }
 0x198   :  { %v1693_v35 = vpop.f32.mrb[2].mxu1 }
 0x199   :  { %v1694_v38 = vpop.f32.mrb[3].mxu1 }
 0x19a   :  { %v1695_v40 = vadd.f32 %v1694_v38, %v1693_v35 }
 0x19c   :  { %v436_v59 = vadd.f32 %v1695_v40, %v1660_v30 }
 0x1b8   :  { %v1728_v53 = vpop.f32.mrb[4].mxu1 }
 0x1b9   :  { %v1729_v39 = vpop.f32.mrb[5].mxu1 }
 0x1ba   :  { %v1730_v47 = vadd.f32 %v1729_v39, %v1728_v53 }
 0x1bc   :  { %v574_v27 = vadd.f32 %v1730_v47, %v436_v59 }
 0x1d8   :  { %v1763_v60 = vpop.f32.mrb[6].mxu1 }
 0x1d9   :  { %v1764_v61 = vpop.f32.mrb[7].mxu1 }
 0x1da   :  { %v1765_v44 = vadd.f32 %v1764_v61, %v1763_v60 }
 0x1dc   :  { %v682_v2 = vadd.f32 %v1765_v44, %v574_v27 }
 0x1f8   :  { %v1798_v62 = vpop.f32.mrb[8].mxu1 }
 0x1f9   :  { %v1799_v6 = vpop.f32.mrb[9].mxu1 }
 0x1fa   :  { %v1800_v32 = vadd.f32 %v1799_v6, %v1798_v62 }
 0x1fc   :  { %v850_v10 = vadd.f32 %v1800_v32, %v682_v2 }
 0x212   :  { %v1594_v13 = vpop.f32.mrb[0].mxu0 }
 0x213   :  { %v2147_v28 = vpop.f32.mrb[1].mxu0 }
 0x218   :  { %v1833_v20 = vpop.f32.mrb[10].mxu1 }
 0x219   :  { %v1834_v36 = vpop.f32.mrb[11].mxu1 }
 0x21a   :  { %v1835_v34 = vadd.f32 %v1834_v36, %v1833_v20 }
 0x21c   :  { %v954_v0 = vadd.f32 %v1835_v34, %v850_v10 }
 0x21e   :  { %v2484_v56 = vadd.f32 %v1594_v13, %v954_v0 }
 0x220   :  { %1598 = vst [vmem:[#allocation5] sm:$0xff] %v2484_v56 }
 0x221   :  { %2543 = shalt.err (!%p2540_p12)
}
 0x222   :  { %s2544_s28 = scalar_lea.hbm %s3457_s2, 128 }
 0x223   :  { %p2545_p13 = scmp.ne.s32.totalorder %s3457_s2, %s2544_s28  ;;  %p2548_p0 = scmp.lt.u32.totalorder %s2544_s28, %s3457_s2 }
 0x225   :  { %p2550_p1 = pnand %p2548_p0, %p2545_p13 }
 0x227   :  { %2553 = shalt.err (!%p2550_p1)
}
 0x228   :  { %1608 = dma.vmem_to_hbm [thread:$0]  %s1606_s1, 128, %s3457_s2, [#allocation4]  }
 0x229   :  { %2556 = dma.done.wait [#allocation4], 128  }
 0x22a   :  { %2557 = vsyncadd [#allocation4], 4294967168 }
 0x22b   :  { %1612 = vsyncpa [#allocation3], 1 }
 0x22c   :  { %1613 = vsyncpa [#allocation4], 1 }

</bundles_post_ra>
